<compile_context>
chip_gen: v5e
topology: v5e:2x2
jax: 0.10.0
libtpu: 0.0.40
codegen_flags: <defaults>
</compile_context>

<pallas_src>
import jax
import jax.numpy as jnp
from jax.experimental import pallas as pl
from jax.experimental.pallas import tpu as pltpu


def _round_up(x, m):
    return ((x + m - 1) // m) * m


def _make_kernel(steps_per_part):
    f32 = jnp.float32

    def bmm(a, b):      # per-batch a @ b
        return jnp.einsum("bij,bjk->bik", a, b, preferred_element_type=f32)

    def bmm_rt(a, b):   # per-batch a @ b^T (contract last dims of both)
        return jnp.einsum("bij,bkj->bik", a, b, preferred_element_type=f32)

    def kernel(eye_ref, c12_ref, c21_ref, d12_ref, d21_ref, m1_ref, m2_ref,
               bij_out, orth_out, bij_acc, orth_acc):
        step = pl.program_id(1)

        @pl.when(step == 0)
        def _():
            bij_acc[...] = jnp.zeros_like(bij_acc)
            orth_acc[...] = jnp.zeros_like(orth_acc)

        # (K, K) identity; broadcasts implicitly against (TB, K, K) results —
        # never materialized as a (TB, K, K) temporary.
        eye2d = eye_ref[...]

        def sq_frob_sum(x):
            """sum_b ||x_b - I||_F^2 over the batch block -> (1, 1)."""
            d = x - eye2d
            r = jnp.sum(d * d, axis=-1)               # (TB, K)   lane reduce
            r = jnp.sum(r, axis=-1, keepdims=True)    # (TB, 1)
            return jnp.sum(r, axis=0, keepdims=True)  # (1, 1)

        c12 = c12_ref[...]
        c21 = c21_ref[...]

        # Bijectivity:  ||C12 C21 - I||^2 + ||C21 C12 - I||^2
        bij = sq_frob_sum(bmm(c12, c21)) + sq_frob_sum(bmm(c21, c12))

        # Orthogonality (elastic-basis adjoint), with D = C @ inv(M) fused in
        # the wrapper, re-associated so no explicit transpose is needed:
        #   o1 = (D12 C12^T) M2 ,  o2 = (D21 C21^T) M1
        o1 = bmm(bmm_rt(d12_ref[...], c12), m2_ref[...])
        o2 = bmm(bmm_rt(d21_ref[...], c21), m1_ref[...])
        orth = sq_frob_sum(o1) + sq_frob_sum(o2)

        bij_acc[...] += bij
        orth_acc[...] += orth

        @pl.when(step == steps_per_part - 1)
        def _():
            bij_out[0] = bij_acc[...]
            orth_out[0] = orth_acc[...]

    return kernel


def _tpu_generation():
    """Best-effort (vmem_limit_bytes, tensorcores_per_chip) for this device."""
    vmem_cap = 128 * 1024 * 1024
    try:
        vmem_cap = int(pltpu.get_tpu_info().vmem_capacity_bytes)
    except Exception:
        pass
    kind = ""
    try:
        kind = jax.devices()[0].device_kind.lower()
    except Exception:
        pass
    cores = 1
    if "v7" in kind:
        cores = 2
        vmem_cap = min(vmem_cap, 64 * 1024 * 1024)
    if vmem_cap <= 64 * 1024 * 1024:        # v7x: leave headroom in 64 MiB/TC
        limit = 40 * 1024 * 1024
    else:                                    # v5e / v6e: 128 MiB, VMEM is cheap
        limit = 96 * 1024 * 1024
    return limit, cores


def _choose_block_batch(n, k, dtype_bytes, vmem_limit_bytes):
    """Batch elements per grid step.

    Targets ~6 MiB of input HBM traffic per step, capped by a (8,128)-tiling
    aware VMEM budget: 6 double-buffered inputs (12 tiles) plus ~8 live f32
    temporaries per batch element.
    """
    hbm_per_elem = 6 * k * k * dtype_bytes
    tb = max(8, (6 << 20) // hbm_per_elem)
    sub_mult = 8 * (4 // dtype_bytes)                 # 8 for f32, 16 for bf16
    pad_in = _round_up(k, sub_mult) * _round_up(k, 128) * dtype_bytes
    pad_f32 = _round_up(k, 8) * _round_up(k, 128) * 4
    per_elem_vmem = 12 * pad_in + 8 * pad_f32
    budget = int(vmem_limit_bytes * 0.9)              # headroom: eye, acc, code
    tb = min(tb, max(1, budget // per_elem_vmem), n)
    if tb >= 8:
        tb = (tb // 8) * 8
    return max(1, int(tb))


def hs_surfmnet_loss(C12, C21, evals_1, evals_2, Mk_1, Mk_2,
                     w_bij=1.0, w_orth=1.0,
                     block_batch=None, num_partitions=None,
                     compute_dtype=jnp.float32):
    """JAX/Pallas implementation of HS_SURFMNetLoss.forward.

    Args:
      C12, C21: [N, K, K] functional maps.
      evals_1, evals_2: [N, K] eigenvalues (unused by the forward).
      Mk_1, Mk_2: [N, K, K] mass/metric matrices.
      compute_dtype: dtype of the six batched kernel inputs (f32 default;
        bf16 halves HBM traffic at a small numerics cost).
    Returns:
      dict with scalar 'l_bij' and 'l_orth'.
    """
    del evals_1, evals_2  # not used by the reference forward
    f32 = jnp.float32
    C12 = C12.astype(f32)
    C21 = C21.astype(f32)
    Mk_1 = Mk_1.astype(f32)
    Mk_2 = Mk_2.astype(f32)
    N, K, _ = C12.shape

    # TODO(synk): general (batched) matrix inverse has no clean Pallas
    # equivalent; the inverse and the fused C @ inv(M) products stay in XLA.
    D12 = jnp.matmul(C12, jnp.linalg.inv(Mk_1))   # C12 @ inv(M1)
    D21 = jnp.matmul(C21, jnp.linalg.inv(Mk_2))   # C21 @ inv(M2)

    vmem_limit, num_cores = _tpu_generation()
    dtype_bytes = jnp.dtype(compute_dtype).itemsize
    tb = block_batch if block_batch is not None else _choose_block_batch(
        N, K, dtype_bytes, vmem_limit)
    num_blocks = pl.cdiv(N, tb)
    if num_partitions is not None:
        nc = max(1, int(num_partitions))
    else:
        nc = max(1, min(num_cores, num_blocks))   # 2 only on 2-TC chips (v7x)
    steps = pl.cdiv(num_blocks, nc)
    n_pad = nc * steps * tb

    arrays = [a.astype(compute_dtype) for a in (C12, C21, D12, D21, Mk_1, Mk_2)]
    if n_pad != N:
        # Identity padding: padded entries contribute exactly 0 to both loss
        # terms (I@I - I == 0 and (I I^T) I - I == 0), so no in-kernel mask.
        eye_pad = jnp.broadcast_to(
            jnp.eye(K, dtype=compute_dtype), (n_pad - N, K, K))
        arrays = [jnp.concatenate([a, eye_pad], axis=0) for a in arrays]

    eye = jnp.eye(K, dtype=f32)

    eye_spec = pl.BlockSpec((K, K), lambda c, s: (0, 0))
    mat_spec = pl.BlockSpec((tb, K, K), lambda c, s: (c * steps + s, 0, 0))
    out_spec = pl.BlockSpec((1, 1, 1), lambda c, s: (c, 0, 0))

    cost = pl.CostEstimate(
        flops=6 * 2 * (K ** 3) * n_pad,
        transcendentals=0,
        bytes_accessed=6 * n_pad * K * K * dtype_bytes + K * K * 4 + 2 * nc * 4)

    bij_parts, orth_parts = pl.pallas_call(
        _make_kernel(steps),
        out_shape=(jax.ShapeDtypeStruct((nc, 1, 1), f32),
                   jax.ShapeDtypeStruct((nc, 1, 1), f32)),
        grid_spec=pltpu.PrefetchScalarGridSpec(
            num_scalar_prefetch=0,
            grid=(nc, steps),
            in_specs=[eye_spec] + [mat_spec] * 6,
            out_specs=[out_spec, out_spec],
            scratch_shapes=[pltpu.VMEM((1, 1), f32),
                            pltpu.VMEM((1, 1), f32)]),
        compiler_params=pltpu.CompilerParams(
            dimension_semantics=("parallel", "arbitrary"),
            vmem_limit_bytes=vmem_limit),
        cost_estimate=cost,
    )(eye, *arrays)

    # mean over batch (SquaredFrobeniusLoss criterion) then the loss weights.
    l_bij = jnp.sum(bij_parts) * jnp.asarray(float(w_bij) / N, dtype=f32)
    l_orth = jnp.sum(orth_parts) * jnp.asarray(float(w_orth) / N, dtype=f32)
    return {"l_bij": l_bij, "l_orth": l_orth}


def _reference(C12, C21, Mk_1, Mk_2, w_bij=1.0, w_orth=1.0):
    def crit(a, b):
        return jnp.mean(jnp.sum(jnp.abs(a - b) ** 2, axis=(-2, -1)))

    N, K, _ = C12.shape
    eye = jnp.broadcast_to(jnp.eye(K, dtype=jnp.float32), (N, K, K))
    bij = (crit(jnp.matmul(C12, C21), eye) +
           crit(jnp.matmul(C21, C12), eye)) * w_bij
    C21_adj = jnp.matmul(jnp.linalg.inv(Mk_2),
                         jnp.matmul(jnp.swapaxes(C21, 1, 2), Mk_1))
    C12_adj = jnp.matmul(jnp.linalg.inv(Mk_1),
                         jnp.matmul(jnp.swapaxes(C12, 1, 2), Mk_2))
    orth = (crit(jnp.matmul(C12, C12_adj), eye) +
            crit(jnp.matmul(C21, C21_adj), eye)) * w_orth
    return {"l_bij": bij, "l_orth": orth}


def _make_inputs(key, n, k):
    k1, k2, k3, k4 = jax.random.split(key, 4)
    C12 = jax.random.normal(k1, (n, k, k), dtype=jnp.float32) * 0.1
    C21 = jax.random.normal(k2, (n, k, k), dtype=jnp.float32) * 0.1
    ev1 = jnp.arange(n * k, dtype=jnp.float32).reshape(n, k)
    ev2 = ev1 + 1.0
    # Well-conditioned SPD-ish mass matrices so the inverse is stable.
    A1 = jax.random.normal(k3, (n, k, k), dtype=jnp.float32) * 0.1
    A2 = jax.random.normal(k4, (n, k, k), dtype=jnp.float32) * 0.1
    eyeK = jnp.eye(k, dtype=jnp.float32)
    Mk_1 = jnp.matmul(A1, jnp.swapaxes(A1, 1, 2)) + eyeK
    Mk_2 = jnp.matmul(A2, jnp.swapaxes(A2, 1, 2)) + eyeK
    return C12, C21, ev1, ev2, Mk_1, Mk_2


if __name__ == "__main__":
    key = jax.random.PRNGKey(0)

    # Case 1: small batch, default block/partition selection (single block).
    C12, C21, ev1, ev2, Mk_1, Mk_2 = _make_inputs(key, 2, 32)
    out = hs_surfmnet_loss(C12, C21, ev1, ev2, Mk_1, Mk_2,
                           w_bij=1.0, w_orth=1.0)
    jax.block_until_ready(out)
    ref = _reference(C12, C21, Mk_1, Mk_2, 1.0, 1.0)
    assert jnp.allclose(out["l_bij"], ref["l_bij"], rtol=1e-4, atol=1e-4)
    assert jnp.allclose(out["l_orth"], ref["l_orth"], rtol=1e-4, atol=1e-4)

    # Case 2: exercises batch blocking, the 2-partition "parallel" axis,
    # identity padding of the batch tail, and non-unit loss weights.
    C12, C21, ev1, ev2, Mk_1, Mk_2 = _make_inputs(jax.random.PRNGKey(0), 5, 32)
    out = hs_surfmnet_loss(C12, C21, ev1, ev2, Mk_1, Mk_2,
                           w_bij=2.0, w_orth=0.5,
                           block_batch=2, num_partitions=2)
    jax.block_until_ready(out)
    ref = _reference(C12, C21, Mk_1, Mk_2, 2.0, 0.5)
    assert jnp.allclose(out["l_bij"], ref["l_bij"], rtol=1e-4, atol=1e-4)
    assert jnp.allclose(out["l_orth"], ref["l_orth"], rtol=1e-4, atol=1e-4)

    print("KERNEL_OK")
</pallas_src>

<mosaic_0001>
module attributes {stable_mosaic.version = 11 : i64} {
  func.func @kernel(%arg0: i32, %arg1: i32, %arg2: memref<32x32xf32, #tpu.memory_space<vmem>>, %arg3: memref<2x32x32xf32, #tpu.memory_space<vmem>>, %arg4: memref<2x32x32xf32, #tpu.memory_space<vmem>>, %arg5: memref<2x32x32xf32, #tpu.memory_space<vmem>>, %arg6: memref<2x32x32xf32, #tpu.memory_space<vmem>>, %arg7: memref<2x32x32xf32, #tpu.memory_space<vmem>>, %arg8: memref<2x32x32xf32, #tpu.memory_space<vmem>>, %arg9: memref<1x1x1xf32, #tpu.memory_space<vmem>>, %arg10: memref<1x1x1xf32, #tpu.memory_space<vmem>>, %arg11: memref<1x1xf32, #tpu.memory_space<vmem>>, %arg12: memref<1x1xf32, #tpu.memory_space<vmem>>) attributes {dimension_semantics = [#tpu.dimension_semantics<parallel>, #tpu.dimension_semantics<arbitrary>], iteration_bounds = array<i64: 1, 1>, scalar_prefetch = 0 : i64, scratch_operands = 2 : i64, tpu.core_type = #tpu.core_type<tc>, window_params = [{pipeline_mode = #tpu.pipeline_mode<synchronous>, transform_indices = @transform_0, window_bounds = array<i64: 32, 32>}, {transform_indices = @transform_1, window_bounds = array<i64: 2, 32, 32>}, {transform_indices = @transform_2, window_bounds = array<i64: 2, 32, 32>}, {transform_indices = @transform_3, window_bounds = array<i64: 2, 32, 32>}, {transform_indices = @transform_4, window_bounds = array<i64: 2, 32, 32>}, {transform_indices = @transform_5, window_bounds = array<i64: 2, 32, 32>}, {transform_indices = @transform_6, window_bounds = array<i64: 2, 32, 32>}, {transform_indices = @transform_7, window_bounds = array<i64: 1, 1, 1>}, {transform_indices = @transform_8, window_bounds = array<i64: 1, 1, 1>}]} {
    %c0_i32 = arith.constant 0 : i32
    %0 = arith.cmpi eq, %arg1, %c0_i32 : i32
    %1 = arith.extui %0 : i1 to i32
    %c0_i32_0 = arith.constant 0 : i32
    %2 = arith.cmpi ne, %1, %c0_i32_0 : i32
    scf.if %2 {
      %cst_47 = arith.constant 0.000000e+00 : f32
      %63 = vector.broadcast %cst_47 : f32 to vector<1x1xf32>
      %c0_48 = arith.constant 0 : index
      %c0_49 = arith.constant 0 : index
      %64 = vector.load %arg11[%c0_48, %c0_49] : memref<1x1xf32, #tpu.memory_space<vmem>>, vector<1x1xf32>
      tpu.vector_store %arg11[%c0_48, %c0_49], %63 {strides = array<i32>} : memref<1x1xf32, #tpu.memory_space<vmem>>, vector<1x1xf32>,
      %cst_50 = arith.constant 0.000000e+00 : f32
      %65 = vector.broadcast %cst_50 : f32 to vector<1x1xf32>
      %c0_51 = arith.constant 0 : index
      %c0_52 = arith.constant 0 : index
      %66 = vector.load %arg12[%c0_51, %c0_52] : memref<1x1xf32, #tpu.memory_space<vmem>>, vector<1x1xf32>
      tpu.vector_store %arg12[%c0_51, %c0_52], %65 {strides = array<i32>} : memref<1x1xf32, #tpu.memory_space<vmem>>, vector<1x1xf32>,
    } else {
    }
    %c0 = arith.constant 0 : index
    %c0_1 = arith.constant 0 : index
    %3 = vector.load %arg2[%c0, %c0_1] : memref<32x32xf32, #tpu.memory_space<vmem>>, vector<32x32xf32>
    %c0_2 = arith.constant 0 : index
    %c0_3 = arith.constant 0 : index
    %c0_4 = arith.constant 0 : index
    %4 = vector.load %arg3[%c0_2, %c0_3, %c0_4] : memref<2x32x32xf32, #tpu.memory_space<vmem>>, vector<2x32x32xf32>
    %c0_5 = arith.constant 0 : index
    %c0_6 = arith.constant 0 : index
    %c0_7 = arith.constant 0 : index
    %5 = vector.load %arg4[%c0_5, %c0_6, %c0_7] : memref<2x32x32xf32, #tpu.memory_space<vmem>>, vector<2x32x32xf32>
    "tpu.trace_start"() <{level = 10 : i32, message = "bij,bjk->bik"}> : () -> ()
    %cst = arith.constant dense<0.000000e+00> : vector<2x32x32xf32>
    %6 = tpu.matmul %4, %5, %cst {dimension_numbers = #tpu.dot_dimension_numbers<[2], [1], [1], [2], [0, 0, 0, 1, 1, 2], [0], [0]>} : vector<2x32x32xf32>, vector<2x32x32xf32>, vector<2x32x32xf32> -> vector<2x32x32xf32>
    "tpu.trace_stop"() : () -> ()
    %7 = vector.shape_cast %3 : vector<32x32xf32> to vector<1x32x32xf32>
    %8 = vector.broadcast %7 : vector<1x32x32xf32> to vector<2x32x32xf32>
    %9 = arith.subf %6, %8 : vector<2x32x32xf32>
    %10 = arith.mulf %9, %9 : vector<2x32x32xf32>
    %cst_8 = arith.constant dense<0.000000e+00> : vector<2x32xf32>
    %11 = vector.multi_reduction <add>, %10, %cst_8 [2] : vector<2x32x32xf32> to vector<2x32xf32>
    %cst_9 = arith.constant dense<0.000000e+00> : vector<2xf32>
    %12 = vector.multi_reduction <add>, %11, %cst_9 [1] : vector<2x32xf32> to vector<2xf32>
    %13 = vector.shape_cast %12 : vector<2xf32> to vector<2x1xf32>
    %cst_10 = arith.constant dense<0.000000e+00> : vector<1xf32>
    %14 = vector.multi_reduction <add>, %13, %cst_10 [0] : vector<2x1xf32> to vector<1xf32>
    %15 = vector.shape_cast %14 : vector<1xf32> to vector<1x1xf32>
    "tpu.trace_start"() <{level = 10 : i32, message = "bij,bjk->bik"}> : () -> ()
    %cst_11 = arith.constant dense<0.000000e+00> : vector<2x32x32xf32>
    %16 = tpu.matmul %5, %4, %cst_11 {dimension_numbers = #tpu.dot_dimension_numbers<[2], [1], [1], [2], [0, 0, 0, 1, 1, 2], [0], [0]>} : vector<2x32x32xf32>, vector<2x32x32xf32>, vector<2x32x32xf32> -> vector<2x32x32xf32>
    "tpu.trace_stop"() : () -> ()
    %17 = vector.shape_cast %3 : vector<32x32xf32> to vector<1x32x32xf32>
    %18 = vector.broadcast %17 : vector<1x32x32xf32> to vector<2x32x32xf32>
    %19 = arith.subf %16, %18 : vector<2x32x32xf32>
    %20 = arith.mulf %19, %19 : vector<2x32x32xf32>
    %cst_12 = arith.constant dense<0.000000e+00> : vector<2x32xf32>
    %21 = vector.multi_reduction <add>, %20, %cst_12 [2] : vector<2x32x32xf32> to vector<2x32xf32>
    %cst_13 = arith.constant dense<0.000000e+00> : vector<2xf32>
    %22 = vector.multi_reduction <add>, %21, %cst_13 [1] : vector<2x32xf32> to vector<2xf32>
    %23 = vector.shape_cast %22 : vector<2xf32> to vector<2x1xf32>
    %cst_14 = arith.constant dense<0.000000e+00> : vector<1xf32>
    %24 = vector.multi_reduction <add>, %23, %cst_14 [0] : vector<2x1xf32> to vector<1xf32>
    %25 = vector.shape_cast %24 : vector<1xf32> to vector<1x1xf32>
    %26 = arith.addf %15, %25 : vector<1x1xf32>
    %c0_15 = arith.constant 0 : index
    %c0_16 = arith.constant 0 : index
    %c0_17 = arith.constant 0 : index
    %27 = vector.load %arg5[%c0_15, %c0_16, %c0_17] : memref<2x32x32xf32, #tpu.memory_space<vmem>>, vector<2x32x32xf32>
    "tpu.trace_start"() <{level = 10 : i32, message = "bij,bkj->bik"}> : () -> ()
    %cst_18 = arith.constant dense<0.000000e+00> : vector<2x32x32xf32>
    %28 = tpu.matmul %27, %4, %cst_18 {dimension_numbers = #tpu.dot_dimension_numbers<[2], [2], [1], [1], [0, 0, 0, 1, 1, 1], [0], [0]>} : vector<2x32x32xf32>, vector<2x32x32xf32>, vector<2x32x32xf32> -> vector<2x32x32xf32>
    "tpu.trace_stop"() : () -> ()
    %c0_19 = arith.constant 0 : index
    %c0_20 = arith.constant 0 : index
    %c0_21 = arith.constant 0 : index
    %29 = vector.load %arg8[%c0_19, %c0_20, %c0_21] : memref<2x32x32xf32, #tpu.memory_space<vmem>>, vector<2x32x32xf32>
    "tpu.trace_start"() <{level = 10 : i32, message = "bij,bjk->bik"}> : () -> ()
    %cst_22 = arith.constant dense<0.000000e+00> : vector<2x32x32xf32>
    %30 = tpu.matmul %28, %29, %cst_22 {dimension_numbers = #tpu.dot_dimension_numbers<[2], [1], [1], [2], [0, 0, 0, 1, 1, 2], [0], [0]>} : vector<2x32x32xf32>, vector<2x32x32xf32>, vector<2x32x32xf32> -> vector<2x32x32xf32>
    "tpu.trace_stop"() : () -> ()
    %c0_23 = arith.constant 0 : index
    %c0_24 = arith.constant 0 : index
    %c0_25 = arith.constant 0 : index
    %31 = vector.load %arg6[%c0_23, %c0_24, %c0_25] : memref<2x32x32xf32, #tpu.memory_space<vmem>>, vector<2x32x32xf32>
    "tpu.trace_start"() <{level = 10 : i32, message = "bij,bkj->bik"}> : () -> ()
    %cst_26 = arith.constant dense<0.000000e+00> : vector<2x32x32xf32>
    %32 = tpu.matmul %31, %5, %cst_26 {dimension_numbers = #tpu.dot_dimension_numbers<[2], [2], [1], [1], [0, 0, 0, 1, 1, 1], [0], [0]>} : vector<2x32x32xf32>, vector<2x32x32xf32>, vector<2x32x32xf32> -> vector<2x32x32xf32>
    "tpu.trace_stop"() : () -> ()
    %c0_27 = arith.constant 0 : index
    %c0_28 = arith.constant 0 : index
    %c0_29 = arith.constant 0 : index
    %33 = vector.load %arg7[%c0_27, %c0_28, %c0_29] : memref<2x32x32xf32, #tpu.memory_space<vmem>>, vector<2x32x32xf32>
    "tpu.trace_start"() <{level = 10 : i32, message = "bij,bjk->bik"}> : () -> ()
    %cst_30 = arith.constant dense<0.000000e+00> : vector<2x32x32xf32>
    %34 = tpu.matmul %32, %33, %cst_30 {dimension_numbers = #tpu.dot_dimension_numbers<[2], [1], [1], [2], [0, 0, 0, 1, 1, 2], [0], [0]>} : vector<2x32x32xf32>, vector<2x32x32xf32>, vector<2x32x32xf32> -> vector<2x32x32xf32>
    "tpu.trace_stop"() : () -> ()
    %35 = vector.shape_cast %3 : vector<32x32xf32> to vector<1x32x32xf32>
    %36 = vector.broadcast %35 : vector<1x32x32xf32> to vector<2x32x32xf32>
    %37 = arith.subf %30, %36 : vector<2x32x32xf32>
    %38 = arith.mulf %37, %37 : vector<2x32x32xf32>
    %cst_31 = arith.constant dense<0.000000e+00> : vector<2x32xf32>
    %39 = vector.multi_reduction <add>, %38, %cst_31 [2] : vector<2x32x32xf32> to vector<2x32xf32>
    %cst_32 = arith.constant dense<0.000000e+00> : vector<2xf32>
    %40 = vector.multi_reduction <add>, %39, %cst_32 [1] : vector<2x32xf32> to vector<2xf32>
    %41 = vector.shape_cast %40 : vector<2xf32> to vector<2x1xf32>
    %cst_33 = arith.constant dense<0.000000e+00> : vector<1xf32>
    %42 = vector.multi_reduction <add>, %41, %cst_33 [0] : vector<2x1xf32> to vector<1xf32>
    %43 = vector.shape_cast %42 : vector<1xf32> to vector<1x1xf32>
    %44 = vector.shape_cast %3 : vector<32x32xf32> to vector<1x32x32xf32>
    %45 = vector.broadcast %44 : vector<1x32x32xf32> to vector<2x32x32xf32>
    %46 = arith.subf %34, %45 : vector<2x32x32xf32>
    %47 = arith.mulf %46, %46 : vector<2x32x32xf32>
    %cst_34 = arith.constant dense<0.000000e+00> : vector<2x32xf32>
    %48 = vector.multi_reduction <add>, %47, %cst_34 [2] : vector<2x32x32xf32> to vector<2x32xf32>
    %cst_35 = arith.constant dense<0.000000e+00> : vector<2xf32>
    %49 = vector.multi_reduction <add>, %48, %cst_35 [1] : vector<2x32xf32> to vector<2xf32>
    %50 = vector.shape_cast %49 : vector<2xf32> to vector<2x1xf32>
    %cst_36 = arith.constant dense<0.000000e+00> : vector<1xf32>
    %51 = vector.multi_reduction <add>, %50, %cst_36 [0] : vector<2x1xf32> to vector<1xf32>
    %52 = vector.shape_cast %51 : vector<1xf32> to vector<1x1xf32>
    %53 = arith.addf %43, %52 : vector<1x1xf32>
    %c0_37 = arith.constant 0 : index
    %c0_38 = arith.constant 0 : index
    %54 = vector.load %arg11[%c0_37, %c0_38] : memref<1x1xf32, #tpu.memory_space<vmem>>, vector<1x1xf32>
    %55 = arith.addf %54, %26 : vector<1x1xf32>
    %c0_39 = arith.constant 0 : index
    %c0_40 = arith.constant 0 : index
    %56 = vector.load %arg11[%c0_39, %c0_40] : memref<1x1xf32, #tpu.memory_space<vmem>>, vector<1x1xf32>
    tpu.vector_store %arg11[%c0_39, %c0_40], %55 {strides = array<i32>} : memref<1x1xf32, #tpu.memory_space<vmem>>, vector<1x1xf32>,
    %c0_41 = arith.constant 0 : index
    %c0_42 = arith.constant 0 : index
    %57 = vector.load %arg12[%c0_41, %c0_42] : memref<1x1xf32, #tpu.memory_space<vmem>>, vector<1x1xf32>
    %58 = arith.addf %57, %53 : vector<1x1xf32>
    %c0_43 = arith.constant 0 : index
    %c0_44 = arith.constant 0 : index
    %59 = vector.load %arg12[%c0_43, %c0_44] : memref<1x1xf32, #tpu.memory_space<vmem>>, vector<1x1xf32>
    tpu.vector_store %arg12[%c0_43, %c0_44], %58 {strides = array<i32>} : memref<1x1xf32, #tpu.memory_space<vmem>>, vector<1x1xf32>,
    %c0_i32_45 = arith.constant 0 : i32
    %60 = arith.cmpi eq, %arg1, %c0_i32_45 : i32
    %61 = arith.extui %60 : i1 to i32
    %c0_i32_46 = arith.constant 0 : i32
    %62 = arith.cmpi ne, %61, %c0_i32_46 : i32
    scf.if %62 {
      %c0_47 = arith.constant 0 : index
      %c0_48 = arith.constant 0 : index
      %63 = vector.load %arg11[%c0_47, %c0_48] : memref<1x1xf32, #tpu.memory_space<vmem>>, vector<1x1xf32>
      %c0_49 = arith.constant 0 : index
      %c0_50 = arith.constant 0 : index
      %c0_51 = arith.constant 0 : index
      %64 = vector.load %arg9[%c0_49, %c0_50, %c0_51] : memref<1x1x1xf32, #tpu.memory_space<vmem>>, vector<1x1x1xf32>
      %65 = vector.shape_cast %64 : vector<1x1x1xf32> to vector<1x1xf32>
      %66 = vector.shape_cast %63 : vector<1x1xf32> to vector<1x1x1xf32>
      tpu.vector_store %arg9[%c0_49, %c0_50, %c0_51], %66 {strides = array<i32>} : memref<1x1x1xf32, #tpu.memory_space<vmem>>, vector<1x1x1xf32>,
      %c0_52 = arith.constant 0 : index
      %c0_53 = arith.constant 0 : index
      %67 = vector.load %arg12[%c0_52, %c0_53] : memref<1x1xf32, #tpu.memory_space<vmem>>, vector<1x1xf32>
      %c0_54 = arith.constant 0 : index
      %c0_55 = arith.constant 0 : index
      %c0_56 = arith.constant 0 : index
      %68 = vector.load %arg10[%c0_54, %c0_55, %c0_56] : memref<1x1x1xf32, #tpu.memory_space<vmem>>, vector<1x1x1xf32>
      %69 = vector.shape_cast %68 : vector<1x1x1xf32> to vector<1x1xf32>
      %70 = vector.shape_cast %67 : vector<1x1xf32> to vector<1x1x1xf32>
      tpu.vector_store %arg10[%c0_54, %c0_55, %c0_56], %70 {strides = array<i32>} : memref<1x1x1xf32, #tpu.memory_space<vmem>>, vector<1x1x1xf32>,
    } else {
    }
    return
  }
  func.func @transform_0(%arg0: i32, %arg1: i32) -> (i32, i32) {
    %c0_i32 = arith.constant 0 : i32
    %c0_i32_0 = arith.constant 0 : i32
    %c0_i32_1 = arith.constant 0 : i32
    return %c0_i32, %c0_i32_0 : i32, i32
  }
  func.func @transform_1(%arg0: i32, %arg1: i32) -> (i32, i32, i32) {
    %c1_i32 = arith.constant 1 : i32
    %0 = arith.muli %arg0, %c1_i32 : i32
    %1 = arith.addi %0, %arg1 : i32
    %c0_i32 = arith.constant 0 : i32
    %c0_i32_0 = arith.constant 0 : i32
    %c0_i32_1 = arith.constant 0 : i32
    return %1, %c0_i32, %c0_i32_0 : i32, i32, i32
  }
  func.func @transform_2(%arg0: i32, %arg1: i32) -> (i32, i32, i32) {
    %c1_i32 = arith.constant 1 : i32
    %0 = arith.muli %arg0, %c1_i32 : i32
    %1 = arith.addi %0, %arg1 : i32
    %c0_i32 = arith.constant 0 : i32
    %c0_i32_0 = arith.constant 0 : i32
    %c0_i32_1 = arith.constant 0 : i32
    return %1, %c0_i32, %c0_i32_0 : i32, i32, i32
  }
  func.func @transform_3(%arg0: i32, %arg1: i32) -> (i32, i32, i32) {
    %c1_i32 = arith.constant 1 : i32
    %0 = arith.muli %arg0, %c1_i32 : i32
    %1 = arith.addi %0, %arg1 : i32
    %c0_i32 = arith.constant 0 : i32
    %c0_i32_0 = arith.constant 0 : i32
    %c0_i32_1 = arith.constant 0 : i32
    return %1, %c0_i32, %c0_i32_0 : i32, i32, i32
  }
  func.func @transform_4(%arg0: i32, %arg1: i32) -> (i32, i32, i32) {
    %c1_i32 = arith.constant 1 : i32
    %0 = arith.muli %arg0, %c1_i32 : i32
    %1 = arith.addi %0, %arg1 : i32
    %c0_i32 = arith.constant 0 : i32
    %c0_i32_0 = arith.constant 0 : i32
    %c0_i32_1 = arith.constant 0 : i32
    return %1, %c0_i32, %c0_i32_0 : i32, i32, i32
  }
  func.func @transform_5(%arg0: i32, %arg1: i32) -> (i32, i32, i32) {
    %c1_i32 = arith.constant 1 : i32
    %0 = arith.muli %arg0, %c1_i32 : i32
    %1 = arith.addi %0, %arg1 : i32
    %c0_i32 = arith.constant 0 : i32
    %c0_i32_0 = arith.constant 0 : i32
    %c0_i32_1 = arith.constant 0 : i32
    return %1, %c0_i32, %c0_i32_0 : i32, i32, i32
  }
  func.func @transform_6(%arg0: i32, %arg1: i32) -> (i32, i32, i32) {
    %c1_i32 = arith.constant 1 : i32
    %0 = arith.muli %arg0, %c1_i32 : i32
    %1 = arith.addi %0, %arg1 : i32
    %c0_i32 = arith.constant 0 : i32
    %c0_i32_0 = arith.constant 0 : i32
    %c0_i32_1 = arith.constant 0 : i32
    return %1, %c0_i32, %c0_i32_0 : i32, i32, i32
  }
  func.func @transform_7(%arg0: i32, %arg1: i32) -> (i32, i32, i32) {
    %c0_i32 = arith.constant 0 : i32
    %c0_i32_0 = arith.constant 0 : i32
    %c0_i32_1 = arith.constant 0 : i32
    return %arg0, %c0_i32, %c0_i32_0 : i32, i32, i32
  }
  func.func @transform_8(%arg0: i32, %arg1: i32) -> (i32, i32, i32) {
    %c0_i32 = arith.constant 0 : i32
    %c0_i32_0 = arith.constant 0 : i32
    %c0_i32_1 = arith.constant 0 : i32
    return %arg0, %c0_i32, %c0_i32_0 : i32, i32, i32
  }
}

</mosaic_0001>

<bundles_post_ra>
// kernel: tpu_custom_call.1
= control target key start
LH: loop header
LB: loop body
LE: loop exit
PB: predicated region body
PF: predicated region fallthrough
CT: control target
= control target key end

     0   :  { %14 = vsyncpa [#allocation5], 0  ;;  %s1751_s0 = inlined_call_operand.hbm [shape: f32[32,32], index: 0, kind: input, shape index: {}]   ;;  %s1752_s1 = inlined_call_operand.hbm [shape: f32[2,32,32], index: 1, kind: input, shape index: {}]   ;;  %s1753_s2 = inlined_call_operand.hbm [shape: f32[2,32,32], index: 2, kind: input, shape index: {}]   ;;  %s1754_s3 = inlined_call_operand.hbm [shape: f32[2,32,32], index: 3, kind: input, shape index: {}]   ;;  %s1755_s4 = inlined_call_operand.hbm [shape: f32[2,32,32], index: 4, kind: input, shape index: {}]   ;;  %s1756_s5 = inlined_call_operand.hbm [shape: f32[2,32,32], index: 5, kind: input, shape index: {}]   ;;  %s1757_s6 = inlined_call_operand.hbm [shape: f32[2,32,32], index: 6, kind: input, shape index: {}]   ;;  %s1758_s7 = inlined_call_operand.hbm [shape: f32[1,1,1], index: 7, kind: output, shape index: {0}]   ;;  %s1759_s8 = inlined_call_operand.hbm [shape: f32[1,1,1], index: 8, kind: output, shape index: {1}]  }
   0x1   :  { %15 = vsyncpa [#allocation8], 0 }
   0x2   :  { %16 = vsyncpa [#allocation11], 0 }
   0x3   :  { %17 = vsyncpa [#allocation14], 0 }
   0x4   :  { %18 = vsyncpa [#allocation6], 0 }
   0x5   :  { %19 = vsyncpa [#allocation18], 0  ;;  %s42_s29 = sshll.u32 %s1752_s1, 4  ;;  %s1396_s30 = smov [#allocation7]   ;;  %s43_s29 = int_to_ptr.hbm [resolvable:$true] %s42_s29 }
   0x6   :  { %s44_s9 = sshll.u32 %s1396_s30, 4  ;;  %s78_s12 = sshll.u32 %s1754_s3, 4  ;;  %s45_s9 = int_to_ptr.vmem [resolvable:$true] %s44_s9  ;;  %s79_s12 = int_to_ptr.hbm [resolvable:$true] %s78_s12 }
   0x7   :  { %s1397_s13 = smov 128   ;;  %s1398_s14 = smov 8  }
   0x8   :  { %50 = dma.hbm_to_vmem [thread:$0]  %s43_s29, 1024, %s45_s9, [#allocation8], %s1397_s13, %s1397_s13, %s1398_s14  }
   0x9   :  { %s1399_s15 = smov [#allocation10]   ;;  %s114_s1 = sshll.u32 %s1756_s5, 4  ;;  %s115_s1 = int_to_ptr.hbm [resolvable:$true] %s114_s1 }
   0xa   :  { %s80_s16 = sshll.u32 %s1399_s15, 4  ;;  %s24_s20 = sshll.u32 %s1751_s0, 4  ;;  %s81_s16 = int_to_ptr.vmem [resolvable:$true] %s80_s16  ;;  %s25_s20 = int_to_ptr.hbm [resolvable:$true] %s24_s20 }
   0xb   :  { %86 = dma.hbm_to_vmem [thread:$0]  %s79_s12, 1024, %s81_s16, [#allocation11], %s1397_s13, %s1397_s13, %s1398_s14  }
   0xc   :  { %s1400_s21 = smov [#allocation13]   ;;  %s1401_s23 = smov [#allocation4]  }
   0xd   :  { %s116_s22 = sshll.u32 %s1400_s21, 4  ;;  %s26_s5 = sshll.u32 %s1401_s23, 4  ;;  %s117_s22 = int_to_ptr.vmem [resolvable:$true] %s116_s22  ;;  %s27_s5 = int_to_ptr.vmem [resolvable:$true] %s26_s5 }
   0xe   :  { %122 = dma.hbm_to_vmem [thread:$0]  %s115_s1, 1024, %s117_s22, [#allocation14], %s1397_s13, %s1397_s13, %s1398_s14  }
   0xf   :  { %s60_s26 = sshll.u32 %s1753_s2, 4  ;;  %s96_s28 = sshll.u32 %s1755_s4, 4  ;;  %s61_s26 = int_to_ptr.hbm [resolvable:$true] %s60_s26  ;;  %s97_s28 = int_to_ptr.hbm [resolvable:$true] %s96_s28 }
  0x10   :  { %32 = dma.hbm_to_vmem [thread:$0]  %s25_s20, 512, %s27_s5, [#allocation5], %s1397_s13, %s1397_s13, %s1398_s14  }
  0x11   :  { %s1402_s29 = smov [#allocation9]   ;;  %s1403_s9 = smov [#allocation12]  }
  0x12   :  { %s62_s30 = sshll.u32 %s1402_s29, 4  ;;  %s98_s2 = sshll.u32 %s1403_s9, 4  ;;  %s63_s30 = int_to_ptr.vmem [resolvable:$true] %s62_s30  ;;  %s99_s2 = int_to_ptr.vmem [resolvable:$true] %s98_s2 }
  0x13   :  { %68 = dma.hbm_to_vmem [thread:$0]  %s61_s26, 1024, %s63_s30, [#allocation8], %s1397_s13, %s1397_s13, %s1398_s14  }
  0x14   :  { %s132_s12 = sshll.u32 %s1757_s6, 4  ;;  %s1404_s4 = smov [#allocation15]   ;;  %s133_s12 = int_to_ptr.hbm [resolvable:$true] %s132_s12 }
  0x15   :  { %104 = dma.hbm_to_vmem [thread:$0]  %s97_s28, 1024, %s99_s2, [#allocation11], %s1397_s13, %s1397_s13, %s1398_s14  }
  0x16   :  { %s134_s15 = sshll.u32 %s1404_s4, 4  ;;  %s135_s15 = int_to_ptr.vmem [resolvable:$true] %s134_s15 }
  0x17   :  { %140 = dma.hbm_to_vmem [thread:$0]  %s133_s12, 1024, %s135_s15, [#allocation14], %s1397_s13, %s1397_s13, %s1398_s14  }
  0x18   :  { %1384 = dma.done.wait [#allocation5], 512  }
  0x19   :  { %1385 = vsyncadd [#allocation5], 4294966784 }
  0x1a   :  { %1386 = dma.done.wait [#allocation8], 2048  }
  0x1b   :  { %1387 = vsyncadd [#allocation8], 4294965248 }
  0x1c   :  { %1388 = dma.done.wait [#allocation11], 2048  }
  0x1d   :  { %1389 = vsyncadd [#allocation11], 4294965248 }
  0x1e   :  { %1390 = dma.done.wait [#allocation14], 2048  }
  0x1f   :  { %1391 = vsyncadd [#allocation14], 4294965248  ;;  %v203_v0 = vld [vmem:[#allocation9 + $0x18] sm:$0xff]  ;;  %v202_v3 = vld [vmem:[#allocation9 + $0x10] sm:$0xff]  ;;  %vm208_vm0 = vcmask 261120   ;;  %vm344_vm1 = vcmask 130112  }
  0x20   :  { %v1495_v1 = vld [vmem:[#allocation9 + $0x38] sm:$0xff]  ;;  %233 = vmatpush.msra.mxu0 %v203_v0  ;;  %v206_v4 = vld [vmem:[#allocation9 + $0x30] sm:$0xff]  ;;  %v201_v7 = vld [vmem:[#allocation9 + $0x8] sm:$0xff]  ;;  %vm348_vm2 = vcmask 195712   ;;  %vm352_vm3 = vcmask 261312   ;;  %vm361_vm4 = vcmask 1041409  }
  0x21   :  { %v195_v2 = vld [vmem:[#allocation7 + $0x18] sm:$0xff]  ;;  %274 = vmatpush.msra.mxu1 %v1495_v1  ;;  %v194_v5 = vld [vmem:[#allocation7 + $0x10] sm:$0xff]  ;;  %v205_v8 = vld [vmem:[#allocation9 + $0x28] sm:$0xff]  ;;  %vm364_vm5 = vcmask 254976   ;;  %vm185_vm6 = vcmask 0   ;;  %vm368_vm7 = vcmask 1041408  }
  0x22   :  { %400 = vmatpush.msra.mxu2 %v195_v2  ;;  %v199_v6 = vld [vmem:[#allocation7 + $0x38] sm:$0xff]  ;;  %234 = vmatpush.msra.mxu0 %v202_v3  ;;  %v193_v9 = vld [vmem:[#allocation7 + $0x8] sm:$0xff]  ;;  %v198_v10 = vld [vmem:[#allocation7 + $0x30] sm:$0xff]  ;;  %s1406_s6 = smov [#allocation16]   ;;  %s1063_s17 = sshll.u32 %s1758_s7, 4  ;;  %s1064_s17 = int_to_ptr.hbm [resolvable:$true] %s1063_s17 }
  0x23   :  { %275 = vmatpush.msra.mxu1 %v206_v4  ;;  %441 = vmatpush.msra.mxu3 %v199_v6  ;;  %v200_v11 = vld [vmem:[#allocation9] sm:$0xff]  ;;  %v197_v14 = vld [vmem:[#allocation7 + $0x28] sm:$0xff]  ;;  %v535_v20 = vld [vmem:[#allocation10 + $0x10] sm:$0xff]  ;;  %s1061_s13 = sshll.u32 %s1406_s6, 4  ;;  %s1407_s7 = smov [#allocation17]   ;;  %s1062_s13 = int_to_ptr.vmem [resolvable:$true] %s1061_s13 }
  0x24   :  { %401 = vmatpush.msra.mxu2 %v194_v5  ;;  %v204_v12 = vld [vmem:[#allocation9 + $0x20] sm:$0xff]  ;;  %235 = vmatpush.msra.mxu0 %v201_v7  ;;  %v534_v18 = vld [vmem:[#allocation10 + $0x8] sm:$0xff]  ;;  %v539_v21 = vld [vmem:[#allocation10 + $0x30] sm:$0xff]  ;;  %s1072_s18 = sshll.u32 %s1407_s7, 4  ;;  %s1074_s19 = sshll.u32 %s1759_s8, 4  ;;  %s1073_s18 = int_to_ptr.vmem [resolvable:$true] %s1072_s18  ;;  %s1075_s19 = int_to_ptr.hbm [resolvable:$true] %s1074_s19 }
  0x25   :  { %276 = vmatpush.msra.mxu1 %v205_v8  ;;  %v192_v13 = vld [vmem:[#allocation7] sm:$0xff]  ;;  %442 = vmatpush.msra.mxu3 %v198_v10  ;;  %v538_v19 = vld [vmem:[#allocation10 + $0x28] sm:$0xff]  ;;  %v536_v22 = vld [vmem:[#allocation10 + $0x18] sm:$0xff] }
  0x26   :  { %402 = vmatpush.msra.mxu2 %v193_v9  ;;  %v196_v15 = vld [vmem:[#allocation7 + $0x20] sm:$0xff]  ;;  %236 = vmatpush.msra.mxu0 %v200_v11  ;;  %v540_v23 = vld [vmem:[#allocation10 + $0x38] sm:$0xff]  ;;  %v714_v26 = vld [vmem:[#allocation12 + $0x8] sm:$0xff] }
  0x27   :  { %277 = vmatpush.msra.mxu1 %v204_v12  ;;  %443 = vmatpush.msra.mxu3 %v197_v14  ;;  %v533_v16 = vld [vmem:[#allocation10] sm:$0xff]  ;;  %v718_v27 = vld [vmem:[#allocation12 + $0x28] sm:$0xff]  ;;  %v715_v28 = vld [vmem:[#allocation12 + $0x10] sm:$0xff] }
  0x28   :  { %403 = vmatpush.msra.mxu2 %v192_v13  ;;  %1092 = vmatmul.msk.f32.vlgmr.msra.gmra.mxu0 %vm208_vm0, %v192_v13  ;;  %v537_v17 = vld [vmem:[#allocation10 + $0x20] sm:$0xff]  ;;  %v719_v29 = vld [vmem:[#allocation12 + $0x30] sm:$0xff]  ;;  %v716_v30 = vld [vmem:[#allocation12 + $0x18] sm:$0xff] }
  0x29   :  { %1096 = vmatmul.msk.f32.vlgmr.msra.gmra.mxu1 %vm208_vm0, %v196_v15  ;;  %1100 = vmatmul.msk.f32.vlgmr.msra.gmra.mxu2 %vm208_vm0, %v200_v11  ;;  %v713_v24 = vld [vmem:[#allocation12] sm:$0xff]  ;;  %v720_v31 = vld [vmem:[#allocation12 + $0x38] sm:$0xff]  ;;  %v625_v34 = vld [vmem:[#allocation15 + $0x10] sm:$0xff] }
  0x2a   :  { %1108 = vmatpush.xpose.msk.msrb.mxu0 %vm208_vm0, %v195_v2  ;;  %1116 = vmatpush.xpose.msk.msrb.mxu1 %vm208_vm0, %v199_v6  ;;  %v717_v25 = vld [vmem:[#allocation12 + $0x20] sm:$0xff]  ;;  %v626_v32 = vld [vmem:[#allocation15 + $0x18] sm:$0xff]  ;;  %v629_v35 = vld [vmem:[#allocation15 + $0x30] sm:$0xff] }
  0x2b   :  { %444 = vmatpush.msra.mxu3 %v196_v15  ;;  %v630_v33 = vld [vmem:[#allocation15 + $0x38] sm:$0xff]  ;;  %655 = vmatpush.msrb.mxu2 %v626_v32  ;;  %v624_v36 = vld [vmem:[#allocation15 + $0x8] sm:$0xff]  ;;  %v623_v38 = vld [vmem:[#allocation15] sm:$0xff] }
  0x2c   :  { %1104 = vmatmul.msk.f32.vlgmr.msra.gmra.mxu3 %vm208_vm0, %v204_v12  ;;  %v628_v37 = vld [vmem:[#allocation15 + $0x28] sm:$0xff]  ;;  %v627_v39 = vld [vmem:[#allocation15 + $0x20] sm:$0xff]  ;;  %v806_v45 = vld [vmem:[#allocation13 + $0x18] sm:$0xff] }
  0x2d   :  { %696 = vmatpush.msrb.mxu3 %v630_v33  ;;  %656 = vmatpush.msrb.mxu2 %v625_v34  ;;  %v1548_v40 = vld [vmem:[#allocation4] sm:$0xff]  ;;  %v810_v46 = vld [vmem:[#allocation13 + $0x38] sm:$0xff]  ;;  %v1554_v51 = vld [vmem:[#allocation4 + $0x8] sm:$0xff] }
  0x2e   :  { %1109 = vmatpush.xpose.msk.msrb.mxu0 %vm208_vm0, %v194_v5  ;;  %1117 = vmatpush.xpose.msk.msrb.mxu1 %vm208_vm0, %v198_v10  ;;  %v805_v58 = vld [vmem:[#allocation13 + $0x10] sm:$0xff] }
  0x2f   :  { %697 = vmatpush.msrb.mxu3 %v629_v35  ;;  %657 = vmatpush.msrb.mxu2 %v624_v36  ;;  %v809_v59 = vld [vmem:[#allocation13 + $0x30] sm:$0xff] }
  0x30   :  { %1093 = vmatmul.msk.f32.gmra.mxu0 %vm208_vm0, %v193_v9 }
  0x31   :  { %1097 = vmatmul.msk.f32.gmra.mxu1 %vm208_vm0, %v197_v14  ;;  %1101 = vmatmul.msk.f32.gmra.mxu2 %vm208_vm0, %v201_v7 }
  0x32   :  { %1110 = vmatpush.xpose.msk.msrb.mxu0 %vm208_vm0, %v193_v9  ;;  %1118 = vmatpush.xpose.msk.msrb.mxu1 %vm208_vm0, %v197_v14 }
  0x33   :  { %698 = vmatpush.msrb.mxu3 %v628_v37  ;;  %658 = vmatpush.msrb.mxu2 %v623_v38 }
  0x34   :  { %1105 = vmatmul.msk.f32.gmra.mxu3 %vm208_vm0, %v205_v8 }
  0x35   :  { %699 = vmatpush.msrb.mxu3 %v627_v39  ;;  %835 = vmatpush.msra.mxu2 %v806_v45 }
  0x36   :  { %1111 = vmatpush.xpose.msk.msrb.mxu0 %vm208_vm0, %v192_v13  ;;  %1119 = vmatpush.xpose.msk.msrb.mxu1 %vm208_vm0, %v196_v15 }
  0x37   :  { %876 = vmatpush.msra.mxu3 %v810_v46  ;;  %836 = vmatpush.msra.mxu2 %v805_v58 }
  0x38   :  { %1094 = vmatmul.msk.f32.gmra.mxu0 %vm208_vm0, %v194_v5 }
  0x39   :  { %1098 = vmatmul.msk.f32.gmra.mxu1 %vm208_vm0, %v198_v10  ;;  %1102 = vmatmul.msk.f32.gmra.mxu2 %vm208_vm0, %v202_v3  ;;  %v804_v10 = vld [vmem:[#allocation13 + $0x8] sm:$0xff] }
  0x3a   :  { %1132 = vmatpush.xpose.msk.msra.mxu0 %vm208_vm0, %v203_v0  ;;  %1140 = vmatpush.xpose.msk.msra.mxu1 %vm208_vm0, %v1495_v1 }
  0x3b   :  { %877 = vmatpush.msra.mxu3 %v809_v59  ;;  %837 = vmatpush.msra.mxu2 %v804_v10 }
  0x3c   :  { %1106 = vmatmul.msk.f32.gmra.mxu3 %vm208_vm0, %v206_v4 }
  0x3e   :  { %1133 = vmatpush.xpose.msk.msra.mxu0 %vm208_vm0, %v202_v3  ;;  %1141 = vmatpush.xpose.msk.msra.mxu1 %vm208_vm0, %v206_v4 }
  0x40   :  { %1095 = vmatmul.msk.f32.gmra.mxu0 %vm208_vm0, %v195_v2 }
  0x41   :  { %1099 = vmatmul.msk.f32.gmra.mxu1 %vm208_vm0, %v199_v6  ;;  %1103 = vmatmul.msk.f32.gmra.mxu2 %vm208_vm0, %v203_v0 }
  0x42   :  { %1134 = vmatpush.xpose.msk.msra.mxu0 %vm208_vm0, %v201_v7  ;;  %1142 = vmatpush.xpose.msk.msra.mxu1 %vm208_vm0, %v205_v8  ;;  %v1564_v8 = vld [vmem:[#allocation4 + $0x10] sm:$0xff] }
  0x44   :  { %1107 = vmatmul.msk.f32.gmra.mxu3 %vm208_vm0, %v1495_v1 }
  0x46   :  { %1135 = vmatpush.xpose.msk.msra.mxu0 %vm208_vm0, %v200_v11  ;;  %1143 = vmatpush.xpose.msk.msra.mxu1 %vm208_vm0, %v204_v12  ;;  %v808_v11 = vld [vmem:[#allocation13 + $0x28] sm:$0xff] }
  0x47   :  { %878 = vmatpush.msra.mxu3 %v808_v11 }
  0x48   :  { %1112 = vmatmul.msk.f32.vlgmr.msrb.gmra.mxu0 %vm208_vm0, %v533_v16 }
  0x49   :  { %1120 = vmatmul.msk.f32.vlgmr.msrb.gmra.mxu1 %vm208_vm0, %v537_v17 }
  0x50   :  { %1113 = vmatmul.msk.f32.gmra.mxu0 %vm208_vm0, %v534_v18 }
  0x51   :  { %1121 = vmatmul.msk.f32.gmra.mxu1 %vm208_vm0, %v538_v19 }
  0x58   :  { %1114 = vmatmul.msk.f32.gmra.mxu0 %vm208_vm0, %v535_v20 }
  0x59   :  { %1122 = vmatmul.msk.f32.gmra.mxu1 %vm208_vm0, %v539_v21 }
  0x60   :  { %1115 = vmatmul.msk.f32.gmra.mxu0 %vm208_vm0, %v536_v22 }
  0x61   :  { %1123 = vmatmul.msk.f32.gmra.mxu1 %vm208_vm0, %v540_v23 }
  0x68   :  { %1136 = vmatmul.msk.f32.vlgmr.msra.gmra.mxu0 %vm208_vm0, %v713_v24 }
  0x69   :  { %1144 = vmatmul.msk.f32.vlgmr.msra.gmra.mxu1 %vm208_vm0, %v717_v25 }
  0x70   :  { %1137 = vmatmul.msk.f32.gmra.mxu0 %vm208_vm0, %v714_v26 }
  0x71   :  { %1145 = vmatmul.msk.f32.gmra.mxu1 %vm208_vm0, %v718_v27  ;;  %v803_v27 = vld [vmem:[#allocation13] sm:$0xff] }
  0x72   :  { %838 = vmatpush.msra.mxu2 %v803_v27 }
  0x78   :  { %1138 = vmatmul.msk.f32.gmra.mxu0 %vm208_vm0, %v715_v28  ;;  %v807_v28 = vld [vmem:[#allocation13 + $0x20] sm:$0xff] }
  0x79   :  { %1146 = vmatmul.msk.f32.gmra.mxu1 %vm208_vm0, %v719_v29  ;;  %879 = vmatpush.msra.mxu3 %v807_v28 }
  0x80   :  { %1139 = vmatmul.msk.f32.gmra.mxu0 %vm208_vm0, %v716_v30 }
  0x81   :  { %1147 = vmatmul.msk.f32.gmra.mxu1 %vm208_vm0, %v720_v31  ;;  %v1573_v31 = vld [vmem:[#allocation4 + $0x18] sm:$0xff] }
  0xa5   :  { %v238_v41 = vpop.f32.mrf.mxu0 }
  0xa6   :  { %v279_v42 = vpop.f32.mrf.mxu1  ;;  %v291_v43 = vsub.f32 %v238_v41, %v1548_v40 }
  0xa7   :  { %v295_v44 = vsub.f32 %v279_v42, %v1548_v40 }
  0xa8   :  { %v299_v47 = vmul.f32 %v291_v43, %v291_v43 }
  0xa9   :  { %v303_v48 = vmul.f32 %v295_v44, %v295_v44 }
  0xaa   :  { %v307_v50 = vsel %vm208_vm0, %v299_v47, 0.0 }
  0xab   :  { %v319_v49 = vsel %vm208_vm0, %v303_v48, 0.0  ;;  %308 = vadd.xlane.f32.xlu0 %v307_v50 }
  0xac   :  { %320 = vadd.xlane.f32.xlu1 %v319_v49  ;;  %v405_v52 = vpop.f32.mrf.mxu2 }
  0xad   :  { %v458_v53 = vsub.f32 %v405_v52, %v1548_v40  ;;  %v241_v54 = vpop.f32.mrf.mxu0 }
  0xae   :  { %v282_v55 = vpop.f32.mrf.mxu1  ;;  %v292_v2 = vsub.f32 %v241_v54, %v1554_v51 }
  0xaf   :  { %v296_v56 = vsub.f32 %v282_v55, %v1554_v51  ;;  %v446_v57 = vpop.f32.mrf.mxu3  ;;  %v466_v60 = vmul.f32 %v458_v53, %v458_v53 }
  0xb0   :  { %v462_v61 = vsub.f32 %v446_v57, %v1548_v40  ;;  %v300_v12 = vmul.f32 %v292_v2, %v292_v2 }
  0xb1   :  { %v304_v62 = vmul.f32 %v296_v56, %v296_v56  ;;  %v474_v0 = vsel %vm208_vm0, %v466_v60, 0.0 }
  0xb2   :  { %v470_v63 = vmul.f32 %v462_v61, %v462_v61  ;;  %475 = vadd.xlane.f32.xlu2 %v474_v0  ;;  %v310_v20 = vsel %vm208_vm0, %v300_v12, 0.0 }
  0xb3   :  { %v322_v1 = vsel %vm208_vm0, %v304_v62, 0.0 }
  0xb4   :  { %323 = vadd.xlane.f32.xlu1 %v322_v1  ;;  %v486_v3 = vsel %vm208_vm0, %v470_v63, 0.0  ;;  %v408_v4 = vpop.f32.mrf.mxu2 }
  0xb5   :  { %487 = vadd.xlane.f32.xlu0 %v486_v3  ;;  %v459_v5 = vsub.f32 %v408_v4, %v1554_v51  ;;  %v244_v6 = vpop.f32.mrf.mxu0 }
  0xb6   :  { %v285_v7 = vpop.f32.mrf.mxu1  ;;  %v293_v18 = vsub.f32 %v244_v6, %v1564_v8 }
  0xb7   :  { %v449_v9 = vpop.f32.mrf.mxu3  ;;  %v467_v13 = vmul.f32 %v459_v5, %v459_v5  ;;  %v297_v15 = vsub.f32 %v285_v7, %v1564_v8 }
  0xb8   :  { %v463_v14 = vsub.f32 %v449_v9, %v1554_v51  ;;  %v301_v29 = vmul.f32 %v293_v18, %v293_v18 }
  0xb9   :  { %v477_v17 = vsel %vm208_vm0, %v467_v13, 0.0  ;;  %v305_v22 = vmul.f32 %v297_v15, %v297_v15 }
  0xba   :  { %v471_v16 = vmul.f32 %v463_v14, %v463_v14  ;;  %478 = vadd.xlane.f32.xlu2 %v477_v17  ;;  %v313_v36 = vsel %vm208_vm0, %v301_v29, 0.0 }
  0xbb   :  { %v325_v32 = vsel %vm208_vm0, %v305_v22, 0.0 }
  0xbc   :  { %v489_v19 = vsel %vm208_vm0, %v471_v16, 0.0  ;;  %v411_v21 = vpop.f32.mrf.mxu2 }
  0xbd   :  { %490 = vadd.xlane.f32.xlu1 %v489_v19  ;;  %311 = vadd.xlane.f32.xlu0 %v310_v20  ;;  %v247_v23 = vpop.f32.mrf.mxu0  ;;  %v460_v25 = vsub.f32 %v411_v21, %v1564_v8 }
  0xbe   :  { %v288_v24 = vpop.f32.mrf.mxu1  ;;  %v294_v35 = vsub.f32 %v247_v23, %v1573_v31 }
  0xbf   :  { %v452_v26 = vpop.f32.mrf.mxu3  ;;  %v468_v30 = vmul.f32 %v460_v25, %v460_v25  ;;  %v298_v43 = vsub.f32 %v288_v24, %v1573_v31 }
  0xc0   :  { %v464_v34 = vsub.f32 %v452_v26, %v1564_v8  ;;  %v302_v41 = vmul.f32 %v294_v35, %v294_v35 }
  0xc1   :  { %v480_v33 = vsel %vm208_vm0, %v468_v30, 0.0  ;;  %v306_v47 = vmul.f32 %v298_v43, %v298_v43 }
  0xc2   :  { %326 = vadd.xlane.f32.xlu2 %v325_v32  ;;  %v472_v37 = vmul.f32 %v464_v34, %v464_v34  ;;  %v316_v44 = vsel %vm208_vm0, %v302_v41, 0.0 }
  0xc3   :  { %v328_v48 = vsel %vm208_vm0, %v306_v47, 0.0 }
  0xc4   :  { %v492_v42 = vsel %vm208_vm0, %v472_v37, 0.0  ;;  %v414_v54 = vpop.f32.mrf.mxu2 }
  0xc5   :  { %314 = vadd.xlane.f32.xlu1 %v313_v36  ;;  %481 = vadd.xlane.f32.xlu0 %v480_v33  ;;  %v570_v38 = vpop.f32.mrf.mxu0  ;;  %v461_v56 = vsub.f32 %v414_v54, %v1573_v31 }
  0xc6   :  { %v611_v39 = vpop.f32.mrf.mxu1  ;;  %1124 = vmatmul.msk.f32.vlgmr.msrb.gmra.mxu2 %vm208_vm0, %v570_v38 }
  0xc7   :  { %1128 = vmatmul.msk.f32.vlgmr.msrb.gmra.mxu3 %vm208_vm0, %v611_v39  ;;  %v455_v55 = vpop.f32.mrf.mxu3  ;;  %v469_v58 = vmul.f32 %v461_v56, %v461_v56 }
  0xc8   :  { %v465_v57 = vsub.f32 %v455_v55, %v1573_v31 }
  0xc9   :  { %v483_v60 = vsel %vm208_vm0, %v469_v58, 0.0 }
  0xca   :  { %v473_v59 = vmul.f32 %v465_v57, %v465_v57  ;;  %484 = vadd.xlane.f32.xlu2 %v483_v60 }
  0xcc   :  { %v495_v61 = vsel %vm208_vm0, %v473_v59, 0.0 }
  0xcd   :  { %493 = vadd.xlane.f32.xlu1 %v492_v42  ;;  %317 = vadd.xlane.f32.xlu0 %v316_v44  ;;  %v573_v45 = vpop.f32.mrf.mxu0 }
  0xce   :  { %v614_v46 = vpop.f32.mrf.mxu1  ;;  %1125 = vmatmul.msk.f32.gmra.mxu2 %vm208_vm0, %v573_v45 }
  0xcf   :  { %1129 = vmatmul.msk.f32.gmra.mxu3 %vm208_vm0, %v614_v46 }
  0xd5   :  { %329 = vadd.xlane.f32.xlu1 %v328_v48  ;;  %v576_v49 = vpop.f32.mrf.mxu0  ;;  %496 = vadd.xlane.f32.xlu0 %v495_v61  ;;  %v339_v61 = vlaneseq }
  0xd6   :  { %v617_v50 = vpop.f32.mrf.mxu1  ;;  %1126 = vmatmul.msk.f32.gmra.mxu2 %vm208_vm0, %v576_v49 }
  0xd7   :  { %1130 = vmatmul.msk.f32.gmra.mxu3 %vm208_vm0, %v617_v50 }
  0xdd   :  { %v579_v52 = vpop.f32.mrf.mxu0 }
  0xde   :  { %v620_v53 = vpop.f32.mrf.mxu1  ;;  %1127 = vmatmul.msk.f32.gmra.mxu2 %vm208_vm0, %v579_v52 }
  0xdf   :  { %1131 = vmatmul.msk.f32.gmra.mxu3 %vm208_vm0, %v620_v53 }
  0xe5   :  { %v750_v62 = vpop.f32.mrf.mxu0 }
  0xe6   :  { %v791_v63 = vpop.f32.mrf.mxu1  ;;  %1148 = vmatmul.msk.f32.vlgmr.msra.gmra.mxu2 %vm208_vm0, %v750_v62 }
  0xe7   :  { %1152 = vmatmul.msk.f32.vlgmr.msra.gmra.mxu3 %vm208_vm0, %v791_v63 }
  0xed   :  { %v753_v0 = vpop.f32.mrf.mxu0 }
  0xee   :  { %v794_v1 = vpop.f32.mrf.mxu1  ;;  %1149 = vmatmul.msk.f32.gmra.mxu2 %vm208_vm0, %v753_v0 }
  0xef   :  { %1153 = vmatmul.msk.f32.gmra.mxu3 %vm208_vm0, %v794_v1 }
  0xf5   :  { %v756_v2 = vpop.f32.mrf.mxu0 }
  0xf6   :  { %v797_v3 = vpop.f32.mrf.mxu1  ;;  %1150 = vmatmul.msk.f32.gmra.mxu2 %vm208_vm0, %v756_v2  ;;  %v1640_v2 = vand.u32 127, %v339_v61 }
  0xf7   :  { %1154 = vmatmul.msk.f32.gmra.mxu3 %vm208_vm0, %v797_v3 }
  0xfd   :  { %v759_v4 = vpop.f32.mrf.mxu0 }
  0xfe   :  { %v800_v5 = vpop.f32.mrf.mxu1  ;;  %1151 = vmatmul.msk.f32.gmra.mxu2 %vm208_vm0, %v759_v4 }
  0xff   :  { %1155 = vmatmul.msk.f32.gmra.mxu3 %vm208_vm0, %v800_v5 }
 0x11e   :  { %v1610_v16 = vpop.xlane.xlu0 %308 }
 0x11f   :  { %v1606_v11 = vpop.xlane.xlu1 %320 }
 0x125   :  { %v476_v41 = vpop.xlane.xlu2 %475 }
 0x127   :  { %v1614_v23 = vpop.xlane.xlu1 %323 }
 0x128   :  { %v1618_v28 = vpop.xlane.xlu0 %487 }
 0x12d   :  { %v479_v53 = vpop.xlane.xlu2 %478 }
 0x130   :  { %v1624_v36 = vpop.xlane.xlu1 %490  ;;  %v1627_v42 = vpop.xlane.xlu0 %311 }
 0x135   :  { %v327_v3 = vpop.xlane.xlu2 %326 }
 0x138   :  { %v1632_v49 = vpop.xlane.xlu1 %314  ;;  %v482_v54 = vpop.xlane.xlu0 %481 }
 0x140   :  { %v494_v63 = vpop.xlane.xlu1 %493  ;;  %v1642_v4 = vpop.xlane.xlu0 %317 }
 0x149   :  { %v660_v6 = vpop.f32.mrf.mxu2 }
 0x14a   :  { %v701_v7 = vpop.f32.mrf.mxu3  ;;  %v893_v9 = vsub.f32 %v660_v6, %v1548_v40 }
 0x14b   :  { %v897_v10 = vsub.f32 %v701_v7, %v1548_v40  ;;  %v1645_v7 = vadd.s32 4294967288, %v1640_v2 }
 0x14c   :  { %v901_v12 = vmul.f32 %v893_v9, %v893_v9 }
 0x14d   :  { %v905_v13 = vmul.f32 %v897_v10, %v897_v10  ;;  %v506_v10 = vperm.slane %v476_v41, %v1640_v2 }
 0x14e   :  { %v909_v14 = vsel %vm208_vm0, %v901_v12, 0.0  ;;  %v507_v12 = vperm.slane %v479_v53, %v1645_v7 }
 0x14f   :  { %v921_v15 = vsel %vm208_vm0, %v905_v13, 0.0  ;;  %910 = vadd.xlane.f32.xlu2 %v909_v14 }
 0x150   :  { %922 = vadd.xlane.f32.xlu1 %v921_v15  ;;  %v513_v15 = vperm.slane %v1618_v28, %v1640_v2  ;;  %v354_v28 = vperm.slane %v1606_v11, %v1640_v2 }
 0x151   :  { %v663_v17 = vpop.f32.mrf.mxu2 }
 0x152   :  { %v704_v18 = vpop.f32.mrf.mxu3  ;;  %v894_v19 = vsub.f32 %v663_v17, %v1554_v51  ;;  %v514_v17 = vperm.slane %v1624_v36, %v1645_v7 }
 0x153   :  { %v898_v20 = vsub.f32 %v704_v18, %v1554_v51  ;;  %v1656_v18 = vadd.s32 4294967280, %v1640_v2 }
 0x154   :  { %v902_v21 = vmul.f32 %v894_v19, %v894_v19 }
 0x155   :  { %v906_v22 = vmul.f32 %v898_v20, %v898_v20  ;;  %v357_v11 = vperm.slane %v327_v3, %v1656_v18 }
 0x156   :  { %v912_v25 = vsel %vm208_vm0, %v902_v21, 0.0  ;;  %v509_v21 = vperm.slane %v482_v54, %v1656_v18 }
 0x157   :  { %v924_v24 = vsel %vm208_vm0, %v906_v22, 0.0  ;;  %913 = vadd.xlane.f32.xlu0 %v912_v25  ;;  %v330_v22 = vpop.xlane.xlu1 %329  ;;  %v516_v25 = vperm.slane %v494_v63, %v1656_v18 }
 0x158   :  { %925 = vadd.xlane.f32.xlu2 %v924_v24  ;;  %v508_v24 = vsel %vm344_vm1, %v507_v12, %v506_v10  ;;  %v1405_v10 = vmov 0.0  }
 0x159   :  { %v666_v26 = vpop.f32.mrf.mxu2  ;;  %186 = vst.msk [vmem:[#allocation2] sm:$0x1] %vm185_vm6, %v1405_v10 }
 0x15a   :  { %v707_v27 = vpop.f32.mrf.mxu3  ;;  %v895_v29 = vsub.f32 %v666_v26, %v1564_v8  ;;  %v485_v26 = vpop.xlane.xlu2 %484  ;;  %187 = vst.msk [vmem:[#allocation3] sm:$0x1] %vm185_vm6, %v1405_v10 }
 0x15b   :  { %v899_v30 = vsub.f32 %v707_v27, %v1564_v8  ;;  %v497_v27 = vpop.xlane.xlu0 %496 }
 0x15c   :  { %v903_v32 = vmul.f32 %v895_v29, %v895_v29  ;;  %v355_v29 = vperm.slane %v1614_v23, %v1645_v7 }
 0x15d   :  { %v907_v33 = vmul.f32 %v899_v30, %v899_v30  ;;  %v515_v30 = vsel %vm344_vm1, %v514_v17, %v513_v15 }
 0x15e   :  { %v915_v34 = vsel %vm208_vm0, %v903_v32, 0.0  ;;  %v1670_v32 = vadd.s32 4294967272, %v1640_v2 }
 0x15f   :  { %v927_v35 = vsel %vm208_vm0, %v907_v33, 0.0 }
 0x160   :  { %916 = vadd.xlane.f32.xlu2 %v915_v34  ;;  %928 = vadd.xlane.f32.xlu0 %v927_v35  ;;  %v343_v35 = vperm.slane %v1627_v42, %v1645_v7  ;;  %v511_v23 = vperm.slane %v485_v26, %v1670_v32  ;;  %v518_v41 = vperm.slane %v497_v27, %v1670_v32 }
 0x161   :  { %v669_v37 = vpop.f32.mrf.mxu2  ;;  %v341_v42 = vperm.slane %v1610_v16, %v1640_v2 }
 0x162   :  { %v710_v38 = vpop.f32.mrf.mxu3  ;;  %v896_v39 = vsub.f32 %v669_v37, %v1573_v31 }
 0x163   :  { %v900_v19 = vsub.f32 %v710_v38, %v1573_v31 }
 0x164   :  { %v904_v43 = vmul.f32 %v896_v39, %v896_v39  ;;  %v510_v39 = vsel %vm348_vm2, %v509_v21, %v508_v24 }
 0x165   :  { %v908_v36 = vmul.f32 %v900_v19, %v900_v19  ;;  %v512_v16 = vsel %vm352_vm3, %v511_v23, %v510_v39 }
 0x166   :  { %v918_v44 = vsel %vm208_vm0, %v904_v43, 0.0  ;;  %v517_v43 = vsel %vm348_vm2, %v516_v25, %v515_v30 }
 0x167   :  { %919 = vadd.xlane.f32.xlu1 %v918_v44  ;;  %v359_v44 = vperm.slane %v330_v22, %v1670_v32 }
 0x169   :  { %v840_v45 = vpop.f32.mrf.mxu2 }
 0x16a   :  { %v881_v46 = vpop.f32.mrf.mxu3  ;;  %v967_v47 = vsub.f32 %v840_v45, %v1548_v40 }
 0x16b   :  { %v971_v48 = vsub.f32 %v881_v46, %v1548_v40 }
 0x16c   :  { %v975_v50 = vmul.f32 %v967_v47, %v967_v47  ;;  %v356_v47 = vsel %vm344_vm1, %v355_v29, %v354_v28 }
 0x16d   :  { %v979_v52 = vmul.f32 %v971_v48, %v971_v48  ;;  %v351_v48 = vperm.slane %v1642_v4, %v1670_v32  ;;  %v358_v54 = vsel %vm348_vm2, %v357_v11, %v356_v47 }
 0x16e   :  { %v983_v56 = vsel %vm208_vm0, %v975_v50, 0.0  ;;  %v930_v50 = vsel %vm208_vm0, %v908_v36, 0.0 }
 0x16f   :  { %v995_v55 = vsel %vm208_vm0, %v979_v52, 0.0  ;;  %984 = vadd.xlane.f32.xlu0 %v983_v56  ;;  %v360_v56 = vsel %vm352_vm3, %v359_v44, %v358_v54 }
 0x170   :  { %996 = vadd.xlane.f32.xlu2 %v995_v55  ;;  %v519_v55 = vsel %vm352_vm3, %v518_v41, %v517_v43 }
 0x171   :  { %v843_v57 = vpop.f32.mrf.mxu2 }
 0x172   :  { %v884_v58 = vpop.f32.mrf.mxu3  ;;  %v968_v59 = vsub.f32 %v843_v57, %v1554_v51 }
 0x173   :  { %v972_v60 = vsub.f32 %v884_v58, %v1554_v51 }
 0x174   :  { %v976_v40 = vmul.f32 %v968_v59, %v968_v59  ;;  %v520_v59 = vsel %vm361_vm4, %v519_v55, %v512_v16 }
 0x175   :  { %v980_v62 = vmul.f32 %v972_v60, %v972_v60  ;;  %v522_v61 = vsel %vm364_vm5, %v520_v59, 0.0 }
 0x176   :  { %v986_v0 = vsel %vm208_vm0, %v976_v40, 0.0 }
 0x177   :  { %v998_v1 = vsel %vm208_vm0, %v980_v62, 0.0  ;;  %987 = vadd.xlane.f32.xlu1 %v986_v0 }
 0x178   :  { %999 = vadd.xlane.f32.xlu0 %v998_v1 }
 0x179   :  { %v846_v5 = vpop.f32.mrf.mxu2 }
 0x17a   :  { %v887_v6 = vpop.f32.mrf.mxu3  ;;  %v969_v51 = vsub.f32 %v846_v5, %v1564_v8 }
 0x17b   :  { %v973_v9 = vsub.f32 %v887_v6, %v1564_v8 }
 0x17c   :  { %v977_v13 = vmul.f32 %v969_v51, %v969_v51 }
 0x17d   :  { %v981_v14 = vmul.f32 %v973_v9, %v973_v9 }
 0x17e   :  { %v989_v8 = vsel %vm208_vm0, %v977_v13, 0.0 }
 0x17f   :  { %v1001_v20 = vsel %vm208_vm0, %v981_v14, 0.0  ;;  %990 = vadd.xlane.f32.xlu1 %v989_v8 }
 0x180   :  { %1002 = vadd.xlane.f32.xlu2 %v1001_v20 }
 0x181   :  { %v849_v33 = vpop.f32.mrf.mxu2 }
 0x182   :  { %v890_v34 = vpop.f32.mrf.mxu3  ;;  %v970_v37 = vsub.f32 %v849_v33, %v1573_v31 }
 0x183   :  { %v974_v38 = vsub.f32 %v890_v34, %v1573_v31  ;;  %v347_v31 = vperm.slane %v1632_v49, %v1656_v18  ;;  %v345_v49 = vsel %vm344_vm1, %v343_v35, %v341_v42 }
 0x184   :  { %v978_v45 = vmul.f32 %v970_v37, %v970_v37 }
 0x185   :  { %v982_v46 = vmul.f32 %v974_v38, %v974_v38  ;;  %v349_v57 = vsel %vm348_vm2, %v347_v31, %v345_v49 }
 0x186   :  { %v992_v53 = vsel %vm208_vm0, %v978_v45, 0.0  ;;  %v353_v58 = vsel %vm352_vm3, %v351_v48, %v349_v57 }
 0x187   :  { %v1004_v52 = vsel %vm208_vm0, %v982_v46, 0.0  ;;  %993 = vadd.xlane.f32.xlu0 %v992_v53  ;;  %v362_v60 = vsel %vm361_vm4, %v360_v56, %v353_v58 }
 0x188   :  { %931 = vadd.xlane.f32.xlu2 %v930_v50  ;;  %1005 = vadd.xlane.f32.xlu1 %v1004_v52  ;;  %v365_v40 = vsel %vm364_vm5, %v362_v60, 0.0 }
 0x18f   :  { %523 = vadd.xlane.f32.xlu0 %v522_v61 }
 0x190   :  { %366 = vadd.xlane.f32.xlu2 %v365_v40 }
 0x1c2   :  { %v911_v62 = vpop.xlane.xlu2 %910 }
 0x1c3   :  { %v923_v1 = vpop.xlane.xlu1 %922  ;;  %v941_v19 = vperm.slane %v911_v62, %v1640_v2 }
 0x1c4   :  { %v948_v21 = vperm.slane %v923_v1, %v1640_v2 }
 0x1ca   :  { %v914_v63 = vpop.xlane.xlu0 %913 }
 0x1cb   :  { %v926_v0 = vpop.xlane.xlu2 %925  ;;  %v942_v17 = vperm.slane %v914_v63, %v1645_v7  ;;  %v1042_v63 = vld [vmem:[#allocation2] sm:$0x1] }
 0x1cc   :  { %v949_v15 = vperm.slane %v926_v0, %v1645_v7 }
 0x1cd   :  { %v943_v30 = vsel %vm344_vm1, %v942_v17, %v941_v19 }
 0x1ce   :  { %v950_v29 = vsel %vm344_vm1, %v949_v15, %v948_v21 }
 0x1d3   :  { %v929_v3 = vpop.xlane.xlu0 %928  ;;  %v917_v4 = vpop.xlane.xlu2 %916 }
 0x1d4   :  { %v944_v20 = vperm.slane %v917_v4, %v1656_v18  ;;  %v951_v22 = vperm.slane %v929_v3, %v1656_v18 }
 0x1d6   :  { %v945_v36 = vsel %vm348_vm2, %v944_v20, %v943_v30  ;;  %v952_v39 = vsel %vm348_vm2, %v951_v22, %v950_v29 }
 0x1da   :  { %v920_v5 = vpop.xlane.xlu1 %919 }
 0x1db   :  { %v946_v26 = vperm.slane %v920_v5, %v1670_v32 }
 0x1dd   :  { %v947_v43 = vsel %vm352_vm3, %v946_v26, %v945_v36 }
 0x1e2   :  { %v985_v6 = vpop.xlane.xlu0 %984 }
 0x1e3   :  { %v997_v51 = vpop.xlane.xlu2 %996  ;;  %v1015_v33 = vperm.slane %v985_v6, %v1640_v2 }
 0x1e4   :  { %v1022_v27 = vperm.slane %v997_v51, %v1640_v2 }
 0x1ea   :  { %v988_v9 = vpop.xlane.xlu1 %987 }
 0x1eb   :  { %v1000_v14 = vpop.xlane.xlu0 %999  ;;  %v1016_v24 = vperm.slane %v988_v9, %v1645_v7 }
 0x1ec   :  { %v1023_v8 = vperm.slane %v1000_v14, %v1645_v7 }
 0x1ee   :  { %v1024_v7 = vsel %vm344_vm1, %v1023_v8, %v1022_v27 }
 0x1f2   :  { %v991_v13 = vpop.xlane.xlu1 %990 }
 0x1f3   :  { %v1003_v12 = vpop.xlane.xlu2 %1002  ;;  %v1018_v28 = vperm.slane %v991_v13, %v1656_v18 }
 0x1f4   :  { %v1025_v25 = vperm.slane %v1003_v12, %v1656_v18  ;;  %v1017_v18 = vsel %vm344_vm1, %v1016_v24, %v1015_v33  ;;  %v1046_v24 = vld [vmem:[#allocation3] sm:$0x1] }
 0x1f5   :  { %v1019_v2 = vsel %vm348_vm2, %v1018_v28, %v1017_v18 }
 0x1f6   :  { %v1026_v23 = vsel %vm348_vm2, %v1025_v25, %v1024_v7 }
 0x1fa   :  { %v994_v11 = vpop.xlane.xlu0 %993 }
 0x1fb   :  { %v932_v34 = vpop.xlane.xlu2 %931  ;;  %v1006_v35 = vpop.xlane.xlu1 %1005  ;;  %v1020_v41 = vperm.slane %v994_v11, %v1670_v32 }
 0x1fc   :  { %v953_v37 = vperm.slane %v932_v34, %v1670_v32  ;;  %v1027_v38 = vperm.slane %v1006_v35, %v1670_v32 }
 0x1fd   :  { %v1021_v42 = vsel %vm352_vm3, %v1020_v41, %v1019_v2 }
 0x1fe   :  { %v954_v44 = vsel %vm352_vm3, %v953_v37, %v952_v39  ;;  %v1028_v45 = vsel %vm352_vm3, %v1027_v38, %v1026_v23 }
 0x1ff   :  { %v955_v46 = vsel %vm361_vm4, %v954_v44, %v947_v43  ;;  %v1029_v31 = vsel %vm361_vm4, %v1028_v45, %v1021_v42 }
 0x200   :  { %v957_v47 = vsel %vm364_vm5, %v955_v46, 0.0  ;;  %v1031_v48 = vsel %vm364_vm5, %v1029_v31, 0.0 }
 0x201   :  { %958 = vadd.xlane.f32.xlu1 %v957_v47  ;;  %1032 = vadd.xlane.f32.xlu2 %v1031_v48 }
 0x202   :  { %v524_v52 = vpop.xlane.xlu0 %523 }
 0x203   :  { %v367_v32 = vpop.xlane.xlu2 %366  ;;  %v525_v54 = vsel %vm368_vm7, %v524_v52, 0.0 }
 0x204   :  { %v369_v50 = vsel %vm368_vm7, %v367_v32, 0.0  ;;  %v526_v16 = vrot.slane %v525_v54, 4 }
 0x205   :  { %v370_v53 = vrot.slane %v369_v50, 4 }
 0x206   :  { %v527_v49 = vadd.f32 %v526_v16, %v525_v54 }
 0x207   :  { %v371_v55 = vadd.f32 %v370_v53, %v369_v50 }
 0x208   :  { %v528_v57 = vrot.slane %v527_v49, 2 }
 0x209   :  { %v372_v56 = vrot.slane %v371_v55, 2 }
 0x20a   :  { %v529_v59 = vadd.f32 %v528_v57, %v527_v49 }
 0x20b   :  { %v373_v58 = vadd.f32 %v372_v56, %v371_v55 }
 0x20c   :  { %v530_v61 = vrot.slane %v529_v59, 1 }
 0x20d   :  { %v374_v60 = vrot.slane %v373_v58, 1 }
 0x20e   :  { %v531_v62 = vadd.f32 %v530_v61, %v529_v59 }
 0x20f   :  { %v375_v40 = vadd.f32 %v374_v60, %v373_v58 }
 0x211   :  { %v532_v0 = vadd.f32 %v531_v62, %v375_v40 }
 0x213   :  { %v1043_v1 = vadd.f32 %v1042_v63, %v532_v0 }
 0x215   :  { %1045 = vst.msk [vmem:[#allocation2] sm:$0x1] %vm185_vm6, %v1043_v1 }
 0x21c   :  { %v1052_v3 = vld [vmem:[#allocation2] sm:$0x1] }
 0x21d   :  { %1053 = vst.msk [vmem:[#allocation16] sm:$0x1] %vm185_vm6, %v1052_v3 }
 0x21e   :  { %1066 = dma.vmem_to_hbm [thread:$0]  %s1062_s13, 16, %s1064_s17, [#allocation6]  }
 0x274   :  { %v959_v4 = vpop.xlane.xlu1 %958  ;;  %v1033_v6 = vpop.xlane.xlu2 %1032 }
 0x275   :  { %v960_v5 = vsel %vm368_vm7, %v959_v4, 0.0  ;;  %v1034_v9 = vsel %vm368_vm7, %v1033_v6, 0.0 }
 0x276   :  { %v961_v51 = vrot.slane %v960_v5, 4  ;;  %v1035_v10 = vrot.slane %v1034_v9, 4 }
 0x278   :  { %v962_v12 = vadd.f32 %v961_v51, %v960_v5  ;;  %v1036_v13 = vadd.f32 %v1035_v10, %v1034_v9 }
 0x27a   :  { %v963_v14 = vrot.slane %v962_v12, 2  ;;  %v1037_v15 = vrot.slane %v1036_v13, 2 }
 0x27c   :  { %v964_v17 = vadd.f32 %v963_v14, %v962_v12  ;;  %v1038_v19 = vadd.f32 %v1037_v15, %v1036_v13 }
 0x27e   :  { %v965_v20 = vrot.slane %v964_v17, 1  ;;  %v1039_v8 = vrot.slane %v1038_v19, 1 }
 0x280   :  { %v966_v21 = vadd.f32 %v965_v20, %v964_v17  ;;  %v1040_v22 = vadd.f32 %v1039_v8, %v1038_v19 }
 0x282   :  { %v1041_v25 = vadd.f32 %v1040_v22, %v966_v21 }
 0x284   :  { %v1047_v26 = vadd.f32 %v1046_v24, %v1041_v25 }
 0x286   :  { %1048 = vst.msk [vmem:[#allocation3] sm:$0x1] %vm185_vm6, %v1047_v26 }
 0x28d   :  { %v1054_v27 = vld [vmem:[#allocation3] sm:$0x1] }
 0x28e   :  { %1055 = vst.msk [vmem:[#allocation17] sm:$0x1] %vm185_vm6, %v1054_v27 }
 0x28f   :  { %1077 = dma.vmem_to_hbm [thread:$0]  %s1073_s18, 16, %s1075_s19, [#allocation18]  }
 0x290   :  { %1392 = dma.done.wait [#allocation6], 16  }
 0x291   :  { %1393 = vsyncadd [#allocation6], 4294967280 }
 0x292   :  { %1394 = dma.done.wait [#allocation18], 16  }
 0x293   :  { %1395 = vsyncadd [#allocation18], 4294967280 }
 0x294   :  { %1086 = vsyncpa [#allocation5], 1 }
 0x295   :  { %1087 = vsyncpa [#allocation8], 1 }
 0x296   :  { %1088 = vsyncpa [#allocation11], 1 }
 0x297   :  { %1089 = vsyncpa [#allocation14], 1 }
 0x298   :  { %1090 = vsyncpa [#allocation6], 1 }
 0x299   :  { %1091 = vsyncpa [#allocation18], 1 }

</bundles_post_ra>
